<compile_context>
chip_gen: v6e
topology: v6e:2x2x1
jax: 0.10.0
libtpu: 0.0.40
codegen_flags: <defaults>
</compile_context>

<pallas_src>
import jax
import jax.numpy as jnp
from jax.experimental import pallas as pl
from jax.experimental.pallas import tpu as pltpu

TIME_STEP = 1.0
HIDDEN = 64


def _round_up(x, m):
    return ((x + m - 1) // m) * m


def _dot_h(a, b):
    # high-precision f32 matmul for wrapper-side folding / reference
    return jnp.dot(a, b, precision=jax.lax.Precision.HIGHEST)


# ----------------------------------------------------------------------------
# Kernel: 3 bf16-input MXU matmuls (f32 accumulate) + EUP gate, narrow store.
# ----------------------------------------------------------------------------
def pid_kernel(err_ref, w1_ref, w2_ref, w3_ref, b1_ref, b2_ref, b3_ref, out_ref):
    err = err_ref[...]                                            # [Bt, S] f32

    # pid_rate = sigmoid(5*(rms-1)) == 0.5*(1+tanh(2.5*(rms-1))) -> single EUP tanh.
    # Computed from the f32 error BEFORE the bf16 cast used for the MXU.
    rms = jnp.sqrt(jnp.mean(err * err, axis=1, keepdims=True))    # [Bt, 1]
    rate = 0.5 * (1.0 + jnp.tanh(2.5 * (rms - 1.0)))

    # Fused P/I/D first layers: one [Bt,S] @ [S,192] bf16 MXU push.
    h1 = jnp.maximum(
        jnp.dot(err.astype(jnp.bfloat16), w1_ref[...],
                preferred_element_type=jnp.float32) + b1_ref[...], 0.0)

    # Branch second layers folded into the sum head's first layer: [Bt,192] @ [192,64].
    h2 = jnp.maximum(
        jnp.dot(h1.astype(jnp.bfloat16), w2_ref[...],
                preferred_element_type=jnp.float32) + b2_ref[...], 0.0)

    # Sum head second layer: [Bt,64] @ [64,A]; store stays narrow (A lanes).
    pid = jnp.tanh(
        jnp.dot(h2.astype(jnp.bfloat16), w3_ref[...],
                preferred_element_type=jnp.float32) + b3_ref[...])  # [Bt, A]

    out_ref[...] = rate * pid                                       # [Bt, A]


# ----------------------------------------------------------------------------
# Parameters (PyTorch-layout: weights stored as [in, out], biases [1, out])
# ----------------------------------------------------------------------------
def init_params(key, state_dim, action_dim, hidden=HIDDEN):
    ks = jax.random.split(key, 16)

    def lin(kw, kb, fan_in, fan_out):
        bound = 1.0 / jnp.sqrt(fan_in)
        w = jax.random.uniform(kw, (fan_in, fan_out), jnp.float32, -bound, bound)
        b = jax.random.uniform(kb, (1, fan_out), jnp.float32, -bound, bound)
        return w, b

    params = []
    for br in range(3):                       # P, I, D branches
        w1, b1 = lin(ks[4 * br + 0], ks[4 * br + 1], state_dim, hidden)
        w2, b2 = lin(ks[4 * br + 2], ks[4 * br + 3], hidden, action_dim)
        params += [w1, b1, w2, b2]
    w1, b1 = lin(ks[12], ks[13], 3 * action_dim, hidden)   # sum head
    w2, b2 = lin(ks[14], ks[15], hidden, action_dim)
    params += [w1, b1, w2, b2]
    return params


def fold_params(params, state_dim, action_dim, hidden=HIDDEN, time_step=TIME_STEP):
    """Fold the 16 raw tensors into 3 bf16 weight slabs + 3 f32 biases."""
    (p_w1, p_b1, p_w2, p_b2,
     i_w1, i_b1, i_w2, i_b2,
     d_w1, d_b1, d_w2, d_b2,
     s_w1, s_b1, s_w2, s_b2) = params
    A = action_dim

    # (1) fuse P/I/D first layers: time_step scaling folded into I/D weight columns.
    w1f = jnp.concatenate([p_w1, time_step * i_w1, (1.0 / time_step) * d_w1],
                          axis=1)                                               # [S, 192]
    b1f = jnp.concatenate([p_b1, i_b1, d_b1], axis=1)                           # [1, 192]

    # (2) fold branch output layers into the sum head's first layer.
    w2f = jnp.concatenate([_dot_h(p_w2, s_w1[0:A]),
                           _dot_h(i_w2, s_w1[A:2 * A]),
                           _dot_h(d_w2, s_w1[2 * A:3 * A])], axis=0)            # [192, 64]
    b2f = (_dot_h(p_b2, s_w1[0:A]) + _dot_h(i_b2, s_w1[A:2 * A])
           + _dot_h(d_b2, s_w1[2 * A:3 * A]) + s_b1)                            # [1, 64]

    # (3) cast weights to bf16 for single-pass MXU; biases stay f32 (added post-acc).
    return (w1f.astype(jnp.bfloat16),
            w2f.astype(jnp.bfloat16),
            s_w2.astype(jnp.bfloat16),   # [64, A]
            b1f, b2f, s_b2)              # f32


# ----------------------------------------------------------------------------
# Batch tiling: minimal padding, >=2 grid steps for large batches (v7x megacore)
# ----------------------------------------------------------------------------
def _batch_tiling(batch, b_tile):
    b_pad = _round_up(max(batch, 8), 8)
    n = pl.cdiv(b_pad, b_tile)
    if b_pad > 1024 and n < 2:
        n = 2                              # give v7x's second TensorCore work
    bt = _round_up(pl.cdiv(b_pad, n), 8)   # adaptive tile -> <8 padded rows/tile
    return n * bt, bt, n


# ----------------------------------------------------------------------------
# Wrapper
# ----------------------------------------------------------------------------
def pid_forward(error, folded, action_dim, *, b_tile=2048,
                vmem_limit_bytes=32 * 1024 * 1024):
    # b_tile is sweepable 2048-8192; at 2048 the double-buffered blocks plus f32
    # intermediates are ~10 MiB, under the 32 MiB scoped-VMEM limit set below
    # (which also raises v5e's 16 MiB default and leaves headroom on v7x's
    # 64 MiB physical VMEM).  Raise vmem_limit_bytes if b_tile is pushed higher.
    w1f, w2f, w3f, b1f, b2f, b3f = folded
    B, S = error.shape

    b_pad, bt, n = _batch_tiling(B, b_tile)
    if b_pad != B:
        error = jnp.pad(error, ((0, b_pad - B), (0, 0)))

    out = pl.pallas_call(
        pid_kernel,
        out_shape=jax.ShapeDtypeStruct((b_pad, action_dim), jnp.float32),
        grid=(n,),
        in_specs=[
            pl.BlockSpec((bt, S), lambda i: (i, 0)),          # error tile (f32)
            pl.BlockSpec(w1f.shape, lambda i: (0, 0)),        # [S, 192] bf16
            pl.BlockSpec(w2f.shape, lambda i: (0, 0)),        # [192, 64] bf16
            pl.BlockSpec(w3f.shape, lambda i: (0, 0)),        # [64, A]  bf16
            pl.BlockSpec(b1f.shape, lambda i: (0, 0)),        # [1, 192] f32
            pl.BlockSpec(b2f.shape, lambda i: (0, 0)),        # [1, 64]  f32
            pl.BlockSpec(b3f.shape, lambda i: (0, 0)),        # [1, A]   f32
        ],
        out_specs=pl.BlockSpec((bt, action_dim), lambda i: (i, 0)),
        compiler_params=pltpu.CompilerParams(
            dimension_semantics=("parallel",),
            vmem_limit_bytes=vmem_limit_bytes),
    )(error, w1f, w2f, w3f, b1f, b2f, b3f)

    return out[:B]


# ----------------------------------------------------------------------------
# Pure-JAX reference (unfused, mirrors the PyTorch module in eval mode)
# ----------------------------------------------------------------------------
def pid_forward_ref(error, params, action_dim):
    (p_w1, p_b1, p_w2, p_b2,
     i_w1, i_b1, i_w2, i_b2,
     d_w1, d_b1, d_w2, d_b2,
     s_w1, s_b1, s_w2, s_b2) = params
    err = error
    err_dot = err / TIME_STEP
    err_itgr = TIME_STEP * err
    br = lambda x, w1, b1, w2, b2: _dot_h(jnp.maximum(_dot_h(x, w1) + b1, 0.0), w2) + b2
    p = br(err, p_w1, p_b1, p_w2, p_b2)
    i = br(err_itgr, i_w1, i_b1, i_w2, i_b2)
    d = br(err_dot, d_w1, d_b1, d_w2, d_b2)
    pid_in = jnp.concatenate([p, i, d], axis=-1)
    pid = jnp.tanh(br(pid_in, s_w1, s_b1, s_w2, s_b2))
    rms = jnp.sqrt(jnp.mean(err * err, axis=1, keepdims=True))
    rate = 1.0 / (1.0 + jnp.exp(-5.0 * (rms - 1.0)))
    return rate * pid


if __name__ == "__main__":
    state_dim, action_dim, batch = 16, 4, 2
    key = jax.random.PRNGKey(0)
    k_err, k_params = jax.random.split(key)

    error = jax.random.normal(k_err, (batch, state_dim), jnp.float32)
    raw_params = init_params(k_params, state_dim, action_dim)
    folded = fold_params(raw_params, state_dim, action_dim)

    out = pid_forward(error, folded, action_dim)
    out = jax.block_until_ready(out)

    ref = pid_forward_ref(error, raw_params, action_dim)
    assert out.shape == (batch, action_dim)
    # bf16 MXU inputs + weight-folding reassociation -> loosened tolerance
    # (outputs are tanh-bounded and gated, so absolute error stays small).
    assert jnp.allclose(out, ref, atol=2e-2, rtol=2e-2)
    print("KERNEL_OK")
</pallas_src>

<mosaic_0001>
module attributes {stable_mosaic.version = 11 : i64} {
  func.func @pid_kernel(%arg0: i32, %arg1: memref<8x16xf32, #tpu.memory_space<vmem>>, %arg2: memref<16x192xbf16, #tpu.memory_space<vmem>>, %arg3: memref<192x64xbf16, #tpu.memory_space<vmem>>, %arg4: memref<64x4xbf16, #tpu.memory_space<vmem>>, %arg5: memref<1x192xf32, #tpu.memory_space<vmem>>, %arg6: memref<1x64xf32, #tpu.memory_space<vmem>>, %arg7: memref<1x4xf32, #tpu.memory_space<vmem>>, %arg8: memref<8x4xf32, #tpu.memory_space<vmem>>) attributes {dimension_semantics = [#tpu.dimension_semantics<parallel>], iteration_bounds = array<i64: 1>, scalar_prefetch = 0 : i64, scratch_operands = 0 : i64, tpu.core_type = #tpu.core_type<tc>, window_params = [{transform_indices = @transform_0, window_bounds = array<i64: 8, 16>}, {pipeline_mode = #tpu.pipeline_mode<synchronous>, transform_indices = @transform_1, window_bounds = array<i64: 16, 192>}, {pipeline_mode = #tpu.pipeline_mode<synchronous>, transform_indices = @transform_2, window_bounds = array<i64: 192, 64>}, {pipeline_mode = #tpu.pipeline_mode<synchronous>, transform_indices = @transform_3, window_bounds = array<i64: 64, 4>}, {pipeline_mode = #tpu.pipeline_mode<synchronous>, transform_indices = @transform_4, window_bounds = array<i64: 1, 192>}, {pipeline_mode = #tpu.pipeline_mode<synchronous>, transform_indices = @transform_5, window_bounds = array<i64: 1, 64>}, {pipeline_mode = #tpu.pipeline_mode<synchronous>, transform_indices = @transform_6, window_bounds = array<i64: 1, 4>}, {transform_indices = @transform_7, window_bounds = array<i64: 8, 4>}]} {
    %c0 = arith.constant 0 : index
    %c0_0 = arith.constant 0 : index
    %0 = vector.load %arg1[%c0, %c0_0] : memref<8x16xf32, #tpu.memory_space<vmem>>, vector<8x16xf32>
    %1 = arith.mulf %0, %0 : vector<8x16xf32>
    %cst = arith.constant dense<0.000000e+00> : vector<8xf32>
    %2 = vector.multi_reduction <add>, %1, %cst [1] : vector<8x16xf32> to vector<8xf32>
    %3 = vector.shape_cast %2 : vector<8xf32> to vector<8x1xf32>
    %cst_1 = arith.constant 1.600000e+01 : f32
    %4 = vector.broadcast %cst_1 : f32 to vector<8x1xf32>
    %5 = arith.divf %3, %4 : vector<8x1xf32>
    %6 = math.sqrt %5 : vector<8x1xf32>
    %cst_2 = arith.constant 1.000000e+00 : f32
    %7 = vector.broadcast %cst_2 : f32 to vector<8x1xf32>
    %8 = arith.subf %6, %7 : vector<8x1xf32>
    %cst_3 = arith.constant 2.500000e+00 : f32
    %9 = vector.broadcast %cst_3 : f32 to vector<8x1xf32>
    %10 = arith.mulf %9, %8 : vector<8x1xf32>
    %11 = math.tanh %10 : vector<8x1xf32>
    %cst_4 = arith.constant 1.000000e+00 : f32
    %12 = vector.broadcast %cst_4 : f32 to vector<8x1xf32>
    %13 = arith.addf %12, %11 : vector<8x1xf32>
    %cst_5 = arith.constant 5.000000e-01 : f32
    %14 = vector.broadcast %cst_5 : f32 to vector<8x1xf32>
    %15 = arith.mulf %14, %13 : vector<8x1xf32>
    %16 = arith.truncf %0 : vector<8x16xf32> to vector<8x16xbf16>
    %c0_6 = arith.constant 0 : index
    %c0_7 = arith.constant 0 : index
    %17 = vector.load %arg2[%c0_6, %c0_7] : memref<16x192xbf16, #tpu.memory_space<vmem>>, vector<16x192xbf16>
    %cst_8 = arith.constant dense<0.000000e+00> : vector<8x192xf32>
    %18 = tpu.matmul %16, %17, %cst_8 {dimension_numbers = #tpu.dot_dimension_numbers<[1], [0], [0], [1], [0, 0, 1, 1], [], []>} : vector<8x16xbf16>, vector<16x192xbf16>, vector<8x192xf32> -> vector<8x192xf32>
    %c0_9 = arith.constant 0 : index
    %c0_10 = arith.constant 0 : index
    %19 = vector.load %arg5[%c0_9, %c0_10] : memref<1x192xf32, #tpu.memory_space<vmem>>, vector<1x192xf32>
    %20 = vector.broadcast %19 : vector<1x192xf32> to vector<8x192xf32>
    %21 = arith.addf %18, %20 : vector<8x192xf32>
    %cst_11 = arith.constant 0.000000e+00 : f32
    %22 = vector.broadcast %cst_11 : f32 to vector<8x192xf32>
    %23 = arith.maximumf %21, %22 : vector<8x192xf32>
    %24 = arith.truncf %23 : vector<8x192xf32> to vector<8x192xbf16>
    %c0_12 = arith.constant 0 : index
    %c0_13 = arith.constant 0 : index
    %25 = vector.load %arg3[%c0_12, %c0_13] : memref<192x64xbf16, #tpu.memory_space<vmem>>, vector<192x64xbf16>
    %cst_14 = arith.constant dense<0.000000e+00> : vector<8x64xf32>
    %26 = tpu.matmul %24, %25, %cst_14 {dimension_numbers = #tpu.dot_dimension_numbers<[1], [0], [0], [1], [0, 0, 1, 1], [], []>} : vector<8x192xbf16>, vector<192x64xbf16>, vector<8x64xf32> -> vector<8x64xf32>
    %c0_15 = arith.constant 0 : index
    %c0_16 = arith.constant 0 : index
    %27 = vector.load %arg6[%c0_15, %c0_16] : memref<1x64xf32, #tpu.memory_space<vmem>>, vector<1x64xf32>
    %28 = vector.broadcast %27 : vector<1x64xf32> to vector<8x64xf32>
    %29 = arith.addf %26, %28 : vector<8x64xf32>
    %cst_17 = arith.constant 0.000000e+00 : f32
    %30 = vector.broadcast %cst_17 : f32 to vector<8x64xf32>
    %31 = arith.maximumf %29, %30 : vector<8x64xf32>
    %32 = arith.truncf %31 : vector<8x64xf32> to vector<8x64xbf16>
    %c0_18 = arith.constant 0 : index
    %c0_19 = arith.constant 0 : index
    %33 = vector.load %arg4[%c0_18, %c0_19] : memref<64x4xbf16, #tpu.memory_space<vmem>>, vector<64x4xbf16>
    %cst_20 = arith.constant dense<0.000000e+00> : vector<8x4xf32>
    %34 = tpu.matmul %32, %33, %cst_20 {dimension_numbers = #tpu.dot_dimension_numbers<[1], [0], [0], [1], [0, 0, 1, 1], [], []>} : vector<8x64xbf16>, vector<64x4xbf16>, vector<8x4xf32> -> vector<8x4xf32>
    %c0_21 = arith.constant 0 : index
    %c0_22 = arith.constant 0 : index
    %35 = vector.load %arg7[%c0_21, %c0_22] : memref<1x4xf32, #tpu.memory_space<vmem>>, vector<1x4xf32>
    %36 = vector.broadcast %35 : vector<1x4xf32> to vector<8x4xf32>
    %37 = arith.addf %34, %36 : vector<8x4xf32>
    %38 = math.tanh %37 : vector<8x4xf32>
    %39 = vector.broadcast %15 : vector<8x1xf32> to vector<8x4xf32>
    %40 = arith.mulf %39, %38 : vector<8x4xf32>
    %c0_23 = arith.constant 0 : index
    %c0_24 = arith.constant 0 : index
    %41 = vector.load %arg8[%c0_23, %c0_24] : memref<8x4xf32, #tpu.memory_space<vmem>>, vector<8x4xf32>
    tpu.vector_store %arg8[%c0_23, %c0_24], %40 {strides = array<i32>} : memref<8x4xf32, #tpu.memory_space<vmem>>, vector<8x4xf32>,
    return
  }
  func.func @transform_0(%arg0: i32) -> (i32, i32) {
    %c0_i32 = arith.constant 0 : i32
    %c0_i32_0 = arith.constant 0 : i32
    return %arg0, %c0_i32 : i32, i32
  }
  func.func @transform_1(%arg0: i32) -> (i32, i32) {
    %c0_i32 = arith.constant 0 : i32
    %c0_i32_0 = arith.constant 0 : i32
    %c0_i32_1 = arith.constant 0 : i32
    return %c0_i32, %c0_i32_0 : i32, i32
  }
  func.func @transform_2(%arg0: i32) -> (i32, i32) {
    %c0_i32 = arith.constant 0 : i32
    %c0_i32_0 = arith.constant 0 : i32
    %c0_i32_1 = arith.constant 0 : i32
    return %c0_i32, %c0_i32_0 : i32, i32
  }
  func.func @transform_3(%arg0: i32) -> (i32, i32) {
    %c0_i32 = arith.constant 0 : i32
    %c0_i32_0 = arith.constant 0 : i32
    %c0_i32_1 = arith.constant 0 : i32
    return %c0_i32, %c0_i32_0 : i32, i32
  }
  func.func @transform_4(%arg0: i32) -> (i32, i32) {
    %c0_i32 = arith.constant 0 : i32
    %c0_i32_0 = arith.constant 0 : i32
    %c0_i32_1 = arith.constant 0 : i32
    return %c0_i32, %c0_i32_0 : i32, i32
  }
  func.func @transform_5(%arg0: i32) -> (i32, i32) {
    %c0_i32 = arith.constant 0 : i32
    %c0_i32_0 = arith.constant 0 : i32
    %c0_i32_1 = arith.constant 0 : i32
    return %c0_i32, %c0_i32_0 : i32, i32
  }
  func.func @transform_6(%arg0: i32) -> (i32, i32) {
    %c0_i32 = arith.constant 0 : i32
    %c0_i32_0 = arith.constant 0 : i32
    %c0_i32_1 = arith.constant 0 : i32
    return %c0_i32, %c0_i32_0 : i32, i32
  }
  func.func @transform_7(%arg0: i32) -> (i32, i32) {
    %c0_i32 = arith.constant 0 : i32
    %c0_i32_0 = arith.constant 0 : i32
    return %arg0, %c0_i32 : i32, i32
  }
}

</mosaic_0001>

<bundles_post_ra>
// kernel: tpu_custom_call.1
= control target key start
LH: loop header
LB: loop body
LE: loop exit
PB: predicated region body
PF: predicated region fallthrough
CT: control target
= control target key end

     0   :  { %v428_v1 = vmov 0   ;;  %vm29_vm0 = vcmask 130048   ;;  %v429_v17 = vmov 0.0   ;;  %v52_v20 = vlaneseq  ;;  %s550_s1 = inlined_call_operand.vmem [shape: bf16[16,192], index: 1, kind: input, shape index: {}]   ;;  %s551_s0 = inlined_call_operand.vmem [shape: f32[8,16], index: 0, kind: input, shape index: {}]   ;;  %s552_s2 = inlined_call_operand.vmem [shape: bf16[192,64], index: 2, kind: input, shape index: {}]   ;;  %s553_s3 = inlined_call_operand.vmem [shape: bf16[64,4], index: 3, kind: input, shape index: {}]   ;;  %s554_s4 = inlined_call_operand.vmem [shape: f32[1,192], index: 4, kind: input, shape index: {}]   ;;  %s555_s5 = inlined_call_operand.vmem [shape: f32[1,64], index: 5, kind: input, shape index: {}]   ;;  %s556_s6 = inlined_call_operand.vmem [shape: f32[1,4], index: 6, kind: input, shape index: {}]   ;;  %s557_s7 = inlined_call_operand.vmem [shape: f32[8,4], index: 7, kind: output, shape index: {}]  }
   0x1   :  { %v403_v0 = vld [vmem:[%s550_s1 + $0x4] ss:$8 sps:$4 sm:$0xff]   ;;  %107 = vmatprep.mubr.bf16.mxu0 %v428_v1  ;;  %227 = vmatprep.subr.bf16.mxu1 %v428_v1  ;;  %v405_v2 = vld [vmem:[%s550_s1] ss:$8 sps:$4 sm:$0xff]   ;;  %v406_v5 = vld [vmem:[%s552_s2 + $0x38] sm:$0xff]   ;;  %vm223_vm1 = vcmask 523264  }
   0x2   :  { %v480_v3 = vld [vmem:[%s551_s0] sm:$0xff]  ;;  %89 = vmatprep.subr.bf16.mxu0 %v403_v0  ;;  %228 = vmatpush1.bf16.msra.mxu1 %v406_v5  ;;  %v407_v6 = vld [vmem:[%s552_s2 + $0x30] sm:$0xff]   ;;  %v408_v7 = vld [vmem:[%s552_s2 + $0x28] sm:$0xff]   ;;  %v53_v21 = vshrl.u32 %v52_v20, 7  ;;  %vm430_vm2 = vmmov 0   ;;  %vm353_vm5 = vcmask 31744  }
   0x3   :  { %v47_v4 = vpack.c.bf16 %v480_v3, %v480_v3  ;;  %90 = vmatpush1.bf16.msra.mxu0 %v405_v2  ;;  %229 = vmatprep.subr.bf16.mxu1 %v428_v1  ;;  %v409_v8 = vld [vmem:[%s552_s2 + $0x20] sm:$0xff]   ;;  %v410_v9 = vld [vmem:[%s552_s2 + $0x18] sm:$0xff]   ;;  %v411_v10 = vld [vmem:[%s552_s2 + $0x10] sm:$0xff]   ;;  %v28_v39 = vmul.f32 %v480_v3, %v480_v3 }
   0x4   :  { %v412_v11 = vld [vmem:[%s552_s2 + $0x8] sm:$0xff]   ;;  %v413_v12 = vld [vmem:[%s552_s2] sm:$0xff]   ;;  %v414_v13 = vld [vmem:[%s552_s2 + $0x58] sm:$0xff]   ;;  %388 = vmatprep.subr.bf16.mxu0 %v429_v17  ;;  %v54_v22 = vsub.s32 0, %v53_v21  ;;  %v58_v24 = vsub.s32 1, %v53_v21 }
   0x5   :  { %v415_v14 = vld [vmem:[%s552_s2 + $0x50] sm:$0xff]   ;;  %v416_v15 = vld [vmem:[%s552_s2 + $0x48] sm:$0xff]   ;;  %v417_v16 = vld [vmem:[%s552_s2 + $0x40] sm:$0xff]   ;;  %v30_v40 = vsel %vm29_vm0, %v28_v39, 0.0 }
   0x6   :  { %362 = vmatmul.mubr.msk.bf16.vlgmr.msra.gmra.mxu0 %vm29_vm0, %v47_v4  ;;  %230 = vmatpush1.bf16.msra.mxu1 %v407_v6  ;;  %v418_v18 = vld [vmem:[%s553_s3 + $0x18] sm:$0xff]   ;;  %v419_v19 = vld [vmem:[%s553_s3 + $0x10] sm:$0xff]   ;;  %v50_v23 = vld [vmem:[%s554_s4] sm:$0x3] }
   0x7   :  { %231 = vmatprep.subr.bf16.mxu1 %v428_v1  ;;  %389 = vmatpush3.bf16.msra.mxu0 %v418_v18  ;;  %v55_v25 = vrot.slane %v50_v23, %v54_v22  ;;  %v59_v26 = vrot.slane %v50_v23, %v58_v24  ;;  %v420_v37 = vld [vmem:[%s553_s3 + $0x8] sm:$0xff]   ;;  %v421_v38 = vld [vmem:[%s553_s3] sm:$0xff]  }
   0x8   :  { %390 = vmatprep.subr.bf16.mxu0 %v429_v17  ;;  %396 = vmatprep.mubr.msk.bf16.mxu0 %vm430_vm2, %v429_v17  ;;  %v363_v41 = vld [vmem:[%s555_s5] ss:$0 sm:$0xff] }
   0x9   :  { %31 = vadd.xlane.f32.xlu0 %v30_v40  ;;  %v377_v58 = vld [vmem:[%s556_s6] ss:$0 sm:$0xff] }
   0xa   :  { %232 = vmatpush1.bf16.msra.mxu1 %v408_v7 }
   0xb   :  { %233 = vmatprep.subr.bf16.mxu1 %v428_v1  ;;  %391 = vmatpush3.bf16.msra.mxu0 %v419_v19 }
   0xc   :  { %392 = vmatprep.subr.bf16.mxu0 %v429_v17 }
   0xe   :  { %234 = vmatpush1.bf16.msra.mxu1 %v409_v8 }
   0xf   :  { %235 = vmatprep.subr.bf16.mxu1 %v428_v1  ;;  %393 = vmatpush3.bf16.msra.mxu0 %v420_v37 }
  0x10   :  { %394 = vmatprep.subr.bf16.mxu0 %v429_v17 }
  0x12   :  { %236 = vmatpush1.bf16.msra.mxu1 %v410_v9 }
  0x13   :  { %237 = vmatprep.subr.bf16.mxu1 %v428_v1  ;;  %395 = vmatpush3.bf16.msra.mxu0 %v421_v38 }
  0x16   :  { %238 = vmatpush1.bf16.msra.mxu1 %v411_v10 }
  0x17   :  { %239 = vmatprep.subr.bf16.mxu1 %v428_v1 }
  0x1a   :  { %240 = vmatpush1.bf16.msra.mxu1 %v412_v11 }
  0x1b   :  { %241 = vmatprep.subr.bf16.mxu1 %v428_v1 }
  0x1e   :  { %242 = vmatpush1.bf16.msra.mxu1 %v413_v12 }
  0x1f   :  { %251 = vmatprep.subr.bf16.mxu1 %v428_v1 }
  0x22   :  { %252 = vmatpush2.bf16.msra.mxu1 %v414_v13 }
  0x23   :  { %253 = vmatprep.subr.bf16.mxu1 %v428_v1 }
  0x26   :  { %254 = vmatpush2.bf16.msra.mxu1 %v415_v14 }
  0x27   :  { %255 = vmatprep.subr.bf16.mxu1 %v428_v1 }
  0x2a   :  { %256 = vmatpush2.bf16.msra.mxu1 %v416_v15 }
  0x2b   :  { %257 = vmatprep.subr.bf16.mxu1 %v428_v1 }
  0x2e   :  { %258 = vmatpush2.bf16.msra.mxu1 %v417_v16 }
  0x92   :  { %v32_v49 = vpop.xlane.xlu0 %31 }
  0x93   :  { %v34_v50 = vmul.f32 0.0625, %v32_v49 }
  0x95   :  { %422 = vrsqrt.f32 %v34_v50  ;;  %vm37_vm3 = vcmp.eq.f32.partialorder %v34_v50, inf  ;;  %v40_v53 = vand.u32 2147483648, %v34_v50  ;;  %vm39_vm4 = vcmp.eq.f32.partialorder %v34_v50, 0.0 }
  0xa2   :  { %v423_v51 = vpop.eup %422 }
  0xa3   :  { %v36_v52 = vmul.f32 %v423_v51, %v34_v50 }
  0xa5   :  { %v38_v54 = vsel %vm37_vm3, %v34_v50, %v36_v52 }
  0xa6   :  { %v41_v55 = vsel %vm39_vm4, %v40_v53, %v38_v54 }
  0xa7   :  { %v359_v56 = vadd.f32 -1.0, %v41_v55 }
  0xa9   :  { %v43_v57 = vmul.f32 2.5, %v359_v56 }
  0xab   :  { %424 = vtanh.f32 %v43_v57 }
  0xb8   :  { %v425_v0 = vpop.eup %424 }
  0xb9   :  { %v45_v1 = vadd.f32 1.0, %v425_v0 }
  0xbb   :  { %v46_v2 = vmul.f32 0.5, %v45_v1 }
  0xc6   :  { %v109_v27 = vpop.f32.mrf.mxu0 }
  0xc7   :  { %v110_v28 = vadd.f32 %v109_v27, %v55_v25 }
  0xc8   :  { %v111_v29 = vpop.f32.mrf.mxu0 }
  0xc9   :  { %v112_v30 = vadd.f32 %v111_v29, %v59_v26  ;;  %v116_v31 = vmax.f32 %v110_v28, 0.0 }
  0xca   :  { %v113_v32 = vpop.f32.mrf.mxu0 }
  0xcb   :  { %v117_v33 = vmax.f32 %v112_v30, 0.0  ;;  %v118_v36 = vpack.c.bf16 %v116_v31, %v116_v31 }
  0xcc   :  { %v114_v34 = vpop.f32.mrf.mxu0 }
  0xcd   :  { %v119_v35 = vpack.c.bf16 %v117_v33, %v117_v33 }
  0xcf   :  { %376 = vmatprep.mubr.msk.bf16.mxu1 %vm223_vm1, %v119_v35 }
  0xd0   :  { %260 = vmatmul.mubr.bf16.vlgmr.msra.gmra.mxu1 %v118_v36 }
 0x190   :  { %v261_v42 = vpop.f32.mrf.mxu1 }
 0x191   :  { %v262_v43 = vadd.f32 %v363_v41, %v261_v42 }
 0x192   :  { %v263_v44 = vpop.f32.mrf.mxu1 }
 0x193   :  { %v267_v45 = vmax.f32 %v262_v43, 0.0 }
 0x194   :  { %v264_v46 = vpop.f32.mrf.mxu1 }
 0x195   :  { %v268_v47 = vpack.c.bf16 %v267_v45, %v267_v45 }
 0x196   :  { %v265_v48 = vpop.f32.mrf.mxu1 }
 0x197   :  { %397 = vmatmul.mubr.msk.bf16.vlgmr.msra.gmra.mxu0 %vm223_vm1, %v268_v47 }
 0x257   :  { %v345_v59 = vpop.f32.mrf.mxu0 }
 0x258   :  { %v346_v60 = vadd.f32 %v377_v58, %v345_v59 }
 0x259   :  { %v398_v61 = vpop.f32.mrf.mxu0 }
 0x25a   :  { %426 = vtanh.f32 %v346_v60 }
 0x25b   :  { %v348_v62 = vpop.f32.mrf.mxu0 }
 0x25d   :  { %v399_v63 = vpop.f32.mrf.mxu0 }
 0x267   :  { %v427_v3 = vpop.eup %426 }
 0x268   :  { %v352_v4 = vmul.f32 %v427_v3, %v46_v2 }
 0x26a   :  { %354 = vst.msk [vmem:[%s557_s7] sm:$0xff] %vm353_vm5, %v352_v4 }

</bundles_post_ra>
